<compile_context>
chip_gen: v5e
topology: v5e:2x2
jax: 0.10.0
libtpu: 0.0.40
codegen_flags: <defaults>
</compile_context>

<pallas_src>
import jax
import jax.numpy as jnp
from jax.experimental import pallas as pl
from jax.experimental.pallas import tpu as pltpu


_DEFAULT_LANE_CHUNK = 512      # max lanes processed per inner-loop iteration
_SPATIAL_TILE = 4096           # max lanes per grid step (before VMEM capping)
_MIN_GRID_STEPS = 4            # keep both v7x TensorCores busy when possible


def _cdiv(a, b):
    return -(-a // b)


def _round_up(a, b):
    return _cdiv(a, b) * b


def _vmem_budgets():
    """(block_budget_bytes, vmem_limit_bytes) derived from the chip's VMEM."""
    cap = None
    try:
        cap = getattr(pltpu.get_tpu_info(), "vmem_capacity_bytes", None)
    except Exception:
        cap = None
    if not cap:
        cap = 64 * 1024 * 1024      # conservative fallback: v7x per-TC VMEM
    return int(cap * 0.45), int(cap * 0.70)


def _make_kernel(R, C, n_chunks, lane_chunk):
    """Kernel over one (C, T) lq/out block and R separate (C, T) ref blocks."""

    def chunk_body(off, lq_ref, ref_refs, out_ref):
        lq = lq_ref[:, pl.ds(off, lane_chunk)].astype(jnp.float32)       # (C, LC)

        # ---- pass 1: per-ref squared distances, then ONE batched
        #      sqrt / clamp / exp over the stacked (R, LC) block ------------
        d2_rows = []
        for i in range(R):
            r = ref_refs[i][:, pl.ds(off, lane_chunk)].astype(jnp.float32)
            diff = r - lq
            d2_rows.append(jnp.sum(diff * diff, axis=0, keepdims=True))  # (1, LC)
        d2 = d2_rows[0] if R == 1 else jnp.concatenate(d2_rows, axis=0)  # (R, LC)
        d = jnp.minimum(jnp.sqrt(d2), 100.0)
        e = jnp.exp(-d)                                                  # (R, LC)
        denom = jnp.sum(e, axis=0, keepdims=True) + 1e-9                 # (1, LC)
        w = e * pl.reciprocal(denom, approx=False)                       # (R, LC)

        # ---- pass 2: residual + weighted sum of refs (weights reused,
        #      never recomputed; refs re-read cheaply from VMEM) -----------
        acc = lq
        for i in range(R):
            r = ref_refs[i][:, pl.ds(off, lane_chunk)].astype(jnp.float32)
            acc = acc + r * w[i:i + 1, :]                # (1,LC) bcast over C
        out_ref[:, pl.ds(off, lane_chunk)] = acc.astype(out_ref.dtype)

    def kernel(*args):
        lq_ref = args[0]
        ref_refs = args[1:1 + R]
        out_ref = args[1 + R]
        if n_chunks == 1:
            chunk_body(0, lq_ref, ref_refs, out_ref)
        else:
            @pl.loop(0, n_chunks)
            def _(ci):
                off = pl.multiple_of(ci * lane_chunk, lane_chunk)
                chunk_body(off, lq_ref, ref_refs, out_ref)

    return kernel


def feature_aggregation_exp(lq_f, refs_list, *, spatial_tile=_SPATIAL_TILE,
                            lane_chunk=_DEFAULT_LANE_CHUNK):
    """lq_f: (B, C, H, W); refs_list: list of (B, C, H, W) arrays (len == C)."""
    B, C, H, W = lq_f.shape
    R = len(refs_list)
    # The original PyTorch module's repeat_interleave only works when C == R.
    assert R >= 1 and C == R, "FeatureAggregationExp requires channels == #refs"
    for r in refs_list:
        assert r.shape == lq_f.shape

    HW = H * W
    itemsize = jnp.dtype(lq_f.dtype).itemsize

    # ---- flatten spatial; pad (to a 128-lane multiple) only when unavoidable.
    lq = lq_f.reshape(B, C, HW)
    refs = [r.reshape(B, C, HW) for r in refs_list]
    HW_k = HW
    if HW % 128 != 0:
        HW_k = _round_up(HW, 128)
        pad = HW_k - HW
        lq = jnp.pad(lq, ((0, 0), (0, 0), (0, pad)))
        refs = [jnp.pad(r, ((0, 0), (0, 0), (0, pad))) for r in refs]

    # ---- tile selection -------------------------------------------------
    assert lane_chunk % 128 == 0
    LC = min(int(lane_chunk), _round_up(HW_k, 128))      # adaptive lane chunk
    block_budget, vmem_limit = _vmem_budgets()

    n_total = _cdiv(HW_k, LC)                            # LC-chunks covering HW
    bytes_per_lane = 2 * itemsize * C * (R + 2)          # dbl-buffered lq+refs+out
    max_cpt_vmem = max(1, block_budget // (bytes_per_lane * LC))
    cpt = max(1, min(n_total, max(1, spatial_tile // LC), max_cpt_vmem))
    grid_sp = _cdiv(n_total, cpt)
    cpt = _cdiv(n_total, grid_sp)                        # rebalance -> tighter tail

    # Keep >= _MIN_GRID_STEPS total grid steps when possible (v7x has 2 TCs).
    if B * grid_sp < _MIN_GRID_STEPS and n_total > grid_sp:
        grid_sp = min(n_total, max(grid_sp, _cdiv(_MIN_GRID_STEPS, B)))
        cpt = _cdiv(n_total, grid_sp)
        grid_sp = _cdiv(n_total, cpt)
    T = cpt * LC

    kernel = _make_kernel(R, C, n_chunks=cpt, lane_chunk=LC)

    cost = pl.CostEstimate(
        flops=int(6 * B * R * C * HW_k),
        transcendentals=int(2 * B * R * HW_k),
        bytes_accessed=int(itemsize * B * HW_k * C * (R + 2)),
    )

    spec = pl.BlockSpec((None, C, T), lambda b, s: (b, 0, s))
    out = pl.pallas_call(
        kernel,
        out_shape=jax.ShapeDtypeStruct((B, C, HW_k), lq_f.dtype),
        grid_spec=pltpu.PrefetchScalarGridSpec(
            num_scalar_prefetch=0,
            grid=(B, grid_sp),
            in_specs=[spec] * (R + 1),                   # lq + R separate refs
            out_specs=spec,
        ),
        compiler_params=pltpu.CompilerParams(
            dimension_semantics=("parallel", "parallel"),
            vmem_limit_bytes=int(vmem_limit),
        ),
        cost_estimate=cost,
    )(lq, *refs)

    if HW_k != HW:
        out = out[:, :, :HW]
    return out.reshape(B, C, H, W)


def _reference(lq_f, refs_list):
    """Pure-JAX reference mirroring the PyTorch forward."""
    refs = jnp.stack(refs_list, axis=1)                            # (B, R, C, H, W)
    d = jnp.sqrt(jnp.sum((lq_f[:, None] - refs) ** 2, axis=2))     # (B, R, H, W)
    d = jnp.minimum(d, 100.0)
    e = jnp.exp(-d)
    s = e / (jnp.sum(e, axis=1, keepdims=True) + 1e-9)             # (B, R, H, W)
    out = jnp.sum(refs * s[:, :, None], axis=1)                    # (B, C, H, W)
    return out + lq_f


if __name__ == "__main__":
    key = jax.random.PRNGKey(0)
    B, C, H, W = 2, 4, 16, 16
    R = C  # the module's math requires rcount == channels

    k_lq, *k_refs = jax.random.split(key, R + 1)
    lq_f = jax.random.normal(k_lq, (B, C, H, W), dtype=jnp.float32)
    refs_a = [jax.random.normal(k, (B, C, H, W), dtype=jnp.float32) for k in k_refs]

    out = feature_aggregation_exp(lq_f, refs_a)
    out = jax.block_until_ready(out)

    ref = _reference(lq_f, refs_a)
    assert out.shape == (B, C, H, W)
    assert jnp.allclose(out, ref, atol=1e-5, rtol=1e-5), float(
        jnp.max(jnp.abs(out - ref)))

    print("KERNEL_OK")
</pallas_src>

<mosaic_0001>
module attributes {stable_mosaic.version = 11 : i64} {
  func.func @kernel(%arg0: i32, %arg1: i32, %arg2: memref<1x4x256xf32, #tpu.memory_space<vmem>>, %arg3: memref<1x4x256xf32, #tpu.memory_space<vmem>>, %arg4: memref<1x4x256xf32, #tpu.memory_space<vmem>>, %arg5: memref<1x4x256xf32, #tpu.memory_space<vmem>>, %arg6: memref<1x4x256xf32, #tpu.memory_space<vmem>>, %arg7: memref<1x4x256xf32, #tpu.memory_space<vmem>>) attributes {dimension_semantics = [#tpu.dimension_semantics<parallel>, #tpu.dimension_semantics<parallel>], iteration_bounds = array<i64: 2, 1>, scalar_prefetch = 0 : i64, scratch_operands = 0 : i64, tpu.core_type = #tpu.core_type<tc>, window_params = [{transform_indices = @transform_0, window_bounds = array<i64: 1, 4, 256>}, {transform_indices = @transform_1, window_bounds = array<i64: 1, 4, 256>}, {transform_indices = @transform_2, window_bounds = array<i64: 1, 4, 256>}, {transform_indices = @transform_3, window_bounds = array<i64: 1, 4, 256>}, {transform_indices = @transform_4, window_bounds = array<i64: 1, 4, 256>}, {transform_indices = @transform_5, window_bounds = array<i64: 1, 4, 256>}]} {
    %c0 = arith.constant 0 : index
    %c0_0 = arith.constant 0 : index
    %c0_1 = arith.constant 0 : index
    %0 = vector.load %arg2[%c0, %c0_0, %c0_1] : memref<1x4x256xf32, #tpu.memory_space<vmem>>, vector<1x4x256xf32>
    %1 = vector.shape_cast %0 : vector<1x4x256xf32> to vector<4x256xf32>
    %c0_2 = arith.constant 0 : index
    %c0_3 = arith.constant 0 : index
    %c0_4 = arith.constant 0 : index
    %2 = vector.load %arg3[%c0_2, %c0_3, %c0_4] : memref<1x4x256xf32, #tpu.memory_space<vmem>>, vector<1x4x256xf32>
    %3 = vector.shape_cast %2 : vector<1x4x256xf32> to vector<4x256xf32>
    %4 = arith.subf %3, %1 : vector<4x256xf32>
    %5 = arith.mulf %4, %4 : vector<4x256xf32>
    %cst = arith.constant dense<0.000000e+00> : vector<256xf32>
    %6 = vector.multi_reduction <add>, %5, %cst [0] : vector<4x256xf32> to vector<256xf32>
    %7 = vector.shape_cast %6 : vector<256xf32> to vector<1x256xf32>
    %c0_5 = arith.constant 0 : index
    %c0_6 = arith.constant 0 : index
    %c0_7 = arith.constant 0 : index
    %8 = vector.load %arg4[%c0_5, %c0_6, %c0_7] : memref<1x4x256xf32, #tpu.memory_space<vmem>>, vector<1x4x256xf32>
    %9 = vector.shape_cast %8 : vector<1x4x256xf32> to vector<4x256xf32>
    %10 = arith.subf %9, %1 : vector<4x256xf32>
    %11 = arith.mulf %10, %10 : vector<4x256xf32>
    %cst_8 = arith.constant dense<0.000000e+00> : vector<256xf32>
    %12 = vector.multi_reduction <add>, %11, %cst_8 [0] : vector<4x256xf32> to vector<256xf32>
    %13 = vector.shape_cast %12 : vector<256xf32> to vector<1x256xf32>
    %c0_9 = arith.constant 0 : index
    %c0_10 = arith.constant 0 : index
    %c0_11 = arith.constant 0 : index
    %14 = vector.load %arg5[%c0_9, %c0_10, %c0_11] : memref<1x4x256xf32, #tpu.memory_space<vmem>>, vector<1x4x256xf32>
    %15 = vector.shape_cast %14 : vector<1x4x256xf32> to vector<4x256xf32>
    %16 = arith.subf %15, %1 : vector<4x256xf32>
    %17 = arith.mulf %16, %16 : vector<4x256xf32>
    %cst_12 = arith.constant dense<0.000000e+00> : vector<256xf32>
    %18 = vector.multi_reduction <add>, %17, %cst_12 [0] : vector<4x256xf32> to vector<256xf32>
    %19 = vector.shape_cast %18 : vector<256xf32> to vector<1x256xf32>
    %c0_13 = arith.constant 0 : index
    %c0_14 = arith.constant 0 : index
    %c0_15 = arith.constant 0 : index
    %20 = vector.load %arg6[%c0_13, %c0_14, %c0_15] : memref<1x4x256xf32, #tpu.memory_space<vmem>>, vector<1x4x256xf32>
    %21 = vector.shape_cast %20 : vector<1x4x256xf32> to vector<4x256xf32>
    %22 = arith.subf %21, %1 : vector<4x256xf32>
    %23 = arith.mulf %22, %22 : vector<4x256xf32>
    %cst_16 = arith.constant dense<0.000000e+00> : vector<256xf32>
    %24 = vector.multi_reduction <add>, %23, %cst_16 [0] : vector<4x256xf32> to vector<256xf32>
    %25 = vector.shape_cast %24 : vector<256xf32> to vector<1x256xf32>
    %26 = tpu.concatenate %7, %13, %19, %25 in 0 : vector<1x256xf32>, vector<1x256xf32>, vector<1x256xf32>, vector<1x256xf32> -> vector<4x256xf32>
    %27 = math.sqrt %26 : vector<4x256xf32>
    %cst_17 = arith.constant 1.000000e+02 : f32
    %28 = vector.broadcast %cst_17 : f32 to vector<4x256xf32>
    %29 = arith.minimumf %27, %28 : vector<4x256xf32>
    %cst_18 = arith.constant 0.000000e+00 : f32
    %30 = vector.broadcast %cst_18 : f32 to vector<4x256xf32>
    %31 = arith.subf %30, %29 : vector<4x256xf32>
    %32 = math.exp %31 : vector<4x256xf32>
    %cst_19 = arith.constant dense<0.000000e+00> : vector<256xf32>
    %33 = vector.multi_reduction <add>, %32, %cst_19 [0] : vector<4x256xf32> to vector<256xf32>
    %34 = vector.shape_cast %33 : vector<256xf32> to vector<1x256xf32>
    %cst_20 = arith.constant 9.99999971E-10 : f32
    %35 = vector.broadcast %cst_20 : f32 to vector<1x256xf32>
    %36 = arith.addf %34, %35 : vector<1x256xf32>
    %37 = tpu.reciprocal %36 : vector<1x256xf32> -> vector<1x256xf32>
    %38 = vector.broadcast %37 : vector<1x256xf32> to vector<4x256xf32>
    %39 = arith.mulf %32, %38 : vector<4x256xf32>
    %c0_21 = arith.constant 0 : index
    %c0_22 = arith.constant 0 : index
    %c0_23 = arith.constant 0 : index
    %40 = vector.load %arg3[%c0_21, %c0_22, %c0_23] : memref<1x4x256xf32, #tpu.memory_space<vmem>>, vector<1x4x256xf32>
    %41 = vector.shape_cast %40 : vector<1x4x256xf32> to vector<4x256xf32>
    %42 = vector.extract_strided_slice %39 {offsets = [0, 0], sizes = [1, 256], strides = [1, 1]} : vector<4x256xf32> to vector<1x256xf32>
    %43 = vector.broadcast %42 : vector<1x256xf32> to vector<4x256xf32>
    %44 = arith.mulf %41, %43 : vector<4x256xf32>
    %45 = arith.addf %1, %44 : vector<4x256xf32>
    %c0_24 = arith.constant 0 : index
    %c0_25 = arith.constant 0 : index
    %c0_26 = arith.constant 0 : index
    %46 = vector.load %arg4[%c0_24, %c0_25, %c0_26] : memref<1x4x256xf32, #tpu.memory_space<vmem>>, vector<1x4x256xf32>
    %47 = vector.shape_cast %46 : vector<1x4x256xf32> to vector<4x256xf32>
    %48 = vector.extract_strided_slice %39 {offsets = [1, 0], sizes = [1, 256], strides = [1, 1]} : vector<4x256xf32> to vector<1x256xf32>
    %49 = vector.broadcast %48 : vector<1x256xf32> to vector<4x256xf32>
    %50 = arith.mulf %47, %49 : vector<4x256xf32>
    %51 = arith.addf %45, %50 : vector<4x256xf32>
    %c0_27 = arith.constant 0 : index
    %c0_28 = arith.constant 0 : index
    %c0_29 = arith.constant 0 : index
    %52 = vector.load %arg5[%c0_27, %c0_28, %c0_29] : memref<1x4x256xf32, #tpu.memory_space<vmem>>, vector<1x4x256xf32>
    %53 = vector.shape_cast %52 : vector<1x4x256xf32> to vector<4x256xf32>
    %54 = vector.extract_strided_slice %39 {offsets = [2, 0], sizes = [1, 256], strides = [1, 1]} : vector<4x256xf32> to vector<1x256xf32>
    %55 = vector.broadcast %54 : vector<1x256xf32> to vector<4x256xf32>
    %56 = arith.mulf %53, %55 : vector<4x256xf32>
    %57 = arith.addf %51, %56 : vector<4x256xf32>
    %c0_30 = arith.constant 0 : index
    %c0_31 = arith.constant 0 : index
    %c0_32 = arith.constant 0 : index
    %58 = vector.load %arg6[%c0_30, %c0_31, %c0_32] : memref<1x4x256xf32, #tpu.memory_space<vmem>>, vector<1x4x256xf32>
    %59 = vector.shape_cast %58 : vector<1x4x256xf32> to vector<4x256xf32>
    %60 = vector.extract_strided_slice %39 {offsets = [3, 0], sizes = [1, 256], strides = [1, 1]} : vector<4x256xf32> to vector<1x256xf32>
    %61 = vector.broadcast %60 : vector<1x256xf32> to vector<4x256xf32>
    %62 = arith.mulf %59, %61 : vector<4x256xf32>
    %63 = arith.addf %57, %62 : vector<4x256xf32>
    %c0_33 = arith.constant 0 : index
    %c0_34 = arith.constant 0 : index
    %c0_35 = arith.constant 0 : index
    %64 = vector.load %arg7[%c0_33, %c0_34, %c0_35] : memref<1x4x256xf32, #tpu.memory_space<vmem>>, vector<1x4x256xf32>
    %65 = vector.shape_cast %64 : vector<1x4x256xf32> to vector<4x256xf32>
    %66 = vector.shape_cast %63 : vector<4x256xf32> to vector<1x4x256xf32>
    tpu.vector_store %arg7[%c0_33, %c0_34, %c0_35], %66 {strides = array<i32>} : memref<1x4x256xf32, #tpu.memory_space<vmem>>, vector<1x4x256xf32>,
    return
  }
  func.func @transform_0(%arg0: i32, %arg1: i32) -> (i32, i32, i32) {
    %c0_i32 = arith.constant 0 : i32
    %c0_i32_0 = arith.constant 0 : i32
    return %arg0, %c0_i32, %arg1 : i32, i32, i32
  }
  func.func @transform_1(%arg0: i32, %arg1: i32) -> (i32, i32, i32) {
    %c0_i32 = arith.constant 0 : i32
    %c0_i32_0 = arith.constant 0 : i32
    return %arg0, %c0_i32, %arg1 : i32, i32, i32
  }
  func.func @transform_2(%arg0: i32, %arg1: i32) -> (i32, i32, i32) {
    %c0_i32 = arith.constant 0 : i32
    %c0_i32_0 = arith.constant 0 : i32
    return %arg0, %c0_i32, %arg1 : i32, i32, i32
  }
  func.func @transform_3(%arg0: i32, %arg1: i32) -> (i32, i32, i32) {
    %c0_i32 = arith.constant 0 : i32
    %c0_i32_0 = arith.constant 0 : i32
    return %arg0, %c0_i32, %arg1 : i32, i32, i32
  }
  func.func @transform_4(%arg0: i32, %arg1: i32) -> (i32, i32, i32) {
    %c0_i32 = arith.constant 0 : i32
    %c0_i32_0 = arith.constant 0 : i32
    return %arg0, %c0_i32, %arg1 : i32, i32, i32
  }
  func.func @transform_5(%arg0: i32, %arg1: i32) -> (i32, i32, i32) {
    %c0_i32 = arith.constant 0 : i32
    %c0_i32_0 = arith.constant 0 : i32
    return %arg0, %c0_i32, %arg1 : i32, i32, i32
  }
}

</mosaic_0001>

<bundles_post_ra>
// kernel: tpu_custom_call.1
= control target key start
LH: loop header
LB: loop body
LE: loop exit
PB: predicated region body
PF: predicated region fallthrough
CT: control target
= control target key end

     0   :  { %s1488_s0 = inlined_call_operand.hbm [shape: f32[2,4,256], index: 0, kind: input, shape index: {}]   ;;  %s1489_s1 = inlined_call_operand.hbm [shape: f32[2,4,256], index: 1, kind: input, shape index: {}]   ;;  %s1490_s2 = inlined_call_operand.hbm [shape: f32[2,4,256], index: 2, kind: input, shape index: {}]   ;;  %s1491_s3 = inlined_call_operand.hbm [shape: f32[2,4,256], index: 3, kind: input, shape index: {}]   ;;  %s1492_s4 = inlined_call_operand.hbm [shape: f32[2,4,256], index: 4, kind: input, shape index: {}]   ;;  %s1493_s5 = inlined_call_operand.hbm [shape: f32[2,4,256], index: 5, kind: output, shape index: {}]  }
   0x1   :  { %1500 = sst [smem:[#allocation21_spill]] %s1488_s0 }
   0x2   :  { %1501 = sst [smem:[#allocation22_spill]] %s1489_s1 }
   0x3   :  { %1502 = sst [smem:[#allocation23_spill]] %s1491_s3 }
   0x4   :  { %10 = vsyncpa [#allocation3], 0 }
   0x5   :  { %12 = vsyncpa [#allocation3 + $0x1], 0 }
   0x6   :  { %13 = vsyncpa [#allocation6], 0 }
   0x7   :  { %15 = vsyncpa [#allocation6 + $0x1], 0 }
   0x8   :  { %16 = vsyncpa [#allocation9], 0 }
   0x9   :  { %18 = vsyncpa [#allocation9 + $0x1], 0 }
   0xa   :  { %19 = vsyncpa [#allocation4], 0 }
   0xb   :  { %21 = vsyncpa [#allocation4 + $0x1], 0  ;;  %s1259_s18 = smov 0   ;;  %s1261_s19 = smov 0  }
   0xc   :  { %s1263_s20 = smov 0   ;;  %s1265_s21 = smov 0  }
   0xd   :  { %s1267_s22 = smov 0   ;;  %s1269_s23 = smov 0  }
   0xe LB: > { %1503 = sst [smem:[#allocation16_spill]] %s1215_s20  ;;  %s1290_s24 = sadd.s32 4294967295, %s1227_s23   ;;  %s1227_s23 = sphi %s1269_s23, %s27_s23   ;;  %s1223_s22 = sphi %s1267_s22, %s1522_s22   ;;  %s1219_s21 = sphi %s1265_s21, %s1521_s21   ;;  %s1215_s20 = sphi %s1263_s20, %s1525_s20   ;;  %s1211_s19 = sphi %s1261_s19, %s1524_s19   ;;  %s1207_s18 = sphi %s1259_s18, %s1523_s18  }
   0xf   : > { %1504 = sst [smem:[#allocation17_spill]] %s1223_s22  ;;  %s857_s25 = sadd.s32 4294967294, %s1227_s23  }
  0x10   : > { %1505 = sst [smem:[#allocation18_spill]] %s1227_s23  ;;  %s39_s26 = sadd.s32 1, %s1223_s22 }
  0x11   : > { %s48_s27 = sadd.s32 1, %s1215_s20  ;;  %p41_p0 = scmp.ge.s32.totalorder %s39_s26, 2 }
  0x12   : > { %p55_p1 = scmp.ne.s32.totalorder %s1215_s20, %s1211_s19  ;;  %p56_p2 = scmp.eq.s32.totalorder %s1227_s23, 0 }
  0x13   : > { %p61_p3 = scmp.ne.s32.totalorder %s1211_s19, %s1207_s18  ;;  %s1527_s26 = smov (%p41_p0, %s39_s26), 0 }
  0x14   : > { %1506 = sst [smem:[#allocation19_spill]] %s1527_s26  ;;  %p1302_p4 = por %p56_p2, %p55_p1 }
  0x15   : > { %p62_p5 = scmp.eq.s32.totalorder %s1290_s24, 0  ;;  %s43_s29 = ssub.s32 %s1223_s22, %s1527_s26 }
  0x16   : > { %p199_p6 = scmp.eq.s32.totalorder %s1290_s24, 1  ;;  %p46_p7 = scmp.eq.s32.totalorder %s43_s29, 0 }
  0x17   : > { %p1310_p8 = por %p62_p5, %p61_p3  ;;  %p205_p10 = scmp.eq.s32.totalorder %s857_s25, 1 }
  0x18   : > { %p1314_p9 = por %p199_p6, %p55_p1  ;;  %p859_p12 = scmp.ge.s32.totalorder %s1227_s23, 2 }
  0x19   : > { %s1319_s7 = scalar_select %p46_p7, %s1215_s20, %s48_s27  }
  0x1a   : > { %p1321_p11 = por %p205_p10, %p61_p3  ;;  %p925_p13 = scmp.lt.s32.totalorder %s1227_s23, 2 }
  0x1b   : > { %1510 = sst [smem:[#allocation20_spill]] %s1319_s7  ;;  %s1494_s9 = sand.u32 1, %s1215_s20  }
  0x1c   : > { %s1330_s10 = sshll.u32 %s1494_s9, 3  ;;  %s1333_s11 = sshll.u32 %s1223_s22, 3 }
  0x1d   : > { %p1337_p0 = pnand %p925_p13, %p1302_p4  ;;  %s247_s13 = sand.u32 1, %s1227_s23  }
  0x1e   : > { %s1513_s1 = sld [smem:[#allocation22_spill]]  ;;  %s251_s25 = scalar_lea.vmem [#allocation5], %s1330_s10 }
  0x1f   : > { %s262_s27 = sshll.u32 %s251_s25, 4  ;;  %s248_s28 = scalar_lea.sflag [#allocation6], %s247_s13  ;;  %s263_s27 = int_to_ptr.vmem [resolvable:$true] %s262_s27 }
  0x20   : > { %p875_p1 = scmp.ge.s32.totalorder %s1227_s23, 1  ;;  %p333_p2 = scmp.lt.s32.totalorder %s1227_s23, 3 }
  0x21   : > { %s1515_s3 = sld [smem:[#allocation23_spill]]  ;;  %s295_s9 = scalar_lea.vmem [#allocation8], %s1330_s10 }
  0x22   : > { %p1351_p3 = pnand %p875_p1, %p333_p2  ;;  %s1516_s0 = sld [smem:[#allocation21_spill]] }
  0x23   : > { %s229_s14 = scalar_lea.vmem [#allocation2], %s1330_s10 }
  0x24   : > { %s258_s16 = scalar_lea.hbm %s1513_s1, %s1333_s11  ;;  %s306_s1 = sshll.u32 %s295_s9, 4  ;;  %s307_s1 = int_to_ptr.vmem [resolvable:$true] %s306_s1 }
  0x25   : > { %s260_s17 = sshll.u32 %s258_s16, 4  ;;  %s240_s15 = sshll.u32 %s229_s14, 4  ;;  %s261_s17 = int_to_ptr.hbm [resolvable:$true] %s260_s17  ;;  %s241_s15 = int_to_ptr.vmem [resolvable:$true] %s240_s15 }
  0x26   : > { %911 = dma.hbm_to_vmem [thread:$0]  (!%p1337_p0), %s261_s17, 128, %s263_s27, %s248_s28  }
  0x27   : > { %s302_s16 = scalar_lea.hbm %s1515_s3, %s1333_s11  ;;  %s292_s17 = scalar_lea.sflag [#allocation9], %s247_s13 }
  0x28   : > { %s304_s25 = sshll.u32 %s302_s16, 4  ;;  %s236_s22 = scalar_lea.hbm %s1516_s0, %s1333_s11  ;;  %s305_s25 = int_to_ptr.hbm [resolvable:$true] %s304_s25 }
  0x29   : > { %917 = dma.hbm_to_vmem [thread:$0]  (!%p1337_p0), %s305_s25, 128, %s307_s1, %s292_s17  }
  0x2a   : > { %s238_s3 = sshll.u32 %s236_s22, 4  ;;  %s1517_s16 = sand.u32 1, %s1215_s20   ;;  %s239_s3 = int_to_ptr.hbm [resolvable:$true] %s238_s3 }
  0x2b   : > { %s226_s9 = scalar_lea.sflag [#allocation3], %s1517_s16  ;;  %s280_s1 = scalar_lea.hbm %s1490_s2, %s1333_s11 }
  0x2c   : > { %908 = dma.hbm_to_vmem [thread:$0]  (!%p1337_p0), %s239_s3, 128, %s241_s15, %s226_s9  }
  0x2d   : > { %s273_s25 = scalar_lea.vmem [#allocation7], %s1330_s10  ;;  %s282_s26 = sshll.u32 %s280_s1, 4  ;;  %s283_s26 = int_to_ptr.hbm [resolvable:$true] %s282_s26 }
  0x2e   : > { %s284_s23 = sshll.u32 %s273_s25, 4  ;;  %s324_s14 = scalar_lea.hbm %s1492_s4, %s1333_s11  ;;  %s285_s23 = int_to_ptr.vmem [resolvable:$true] %s284_s23 }
  0x2f   : > { %914 = dma.hbm_to_vmem [thread:$0]  (!%p1337_p0), %s283_s26, 128, %s285_s23, %s248_s28  }
  0x30   : > { %s317_s0 = scalar_lea.vmem [#allocation10], %s1330_s10  ;;  %s326_s16 = sshll.u32 %s324_s14, 4  ;;  %s327_s16 = int_to_ptr.hbm [resolvable:$true] %s326_s16 }
  0x31   : > { %s328_s20 = sshll.u32 %s317_s0, 4  ;;  %337 = sbr.rel (%p1351_p3) target bundleno = 199 (0xc7), region = 40  ;;  %s329_s20 = int_to_ptr.vmem [resolvable:$true] %s328_s20 }
  0x32   : > { %920 = dma.hbm_to_vmem [thread:$0]  (!%p1337_p0), %s327_s16, 128, %s329_s20, %s292_s17  }
  0x33   : > { %s1388_s3 = sand.u32 (!%p1351_p3), 1, %s1211_s19  }
  0x34   : > { %s1391_s23 = sshll.u32 (!%p1351_p3), %s1388_s3, 3  ;;  %s340_s7 = scalar_lea.sflag (!%p1351_p3), [#allocation3], %s1388_s3 }
  0x35   : > { %s343_s10 = scalar_lea.vmem (!%p1351_p3), [#allocation2], %s1391_s23 }
  0x36   : > { %1190 = dma.done.wait (%p1310_p8), %s340_s7, 128  }
  0x37   : > { %1192 = vsyncadd (%p1310_p8), %s340_s7, 4294967168  ;;  %s349_s0 = sand.u32 1, %s1290_s24   ;;  %s353_s11 = scalar_lea.vmem [#allocation5], %s1391_s23 }
  0x38   : > { %s350_s20 = scalar_lea.sflag [#allocation6], %s349_s0 }
  0x39   : > { %1194 = dma.done.wait (%p1310_p8), %s350_s20, 256  }
  0x3a   : > { %1196 = vsyncadd (%p1310_p8), %s350_s20, 4294967040  ;;  %s363_s12 = scalar_lea.vmem [#allocation7], %s1391_s23  ;;  %s370_s28 = scalar_lea.sflag [#allocation9], %s349_s0 }
  0x3b   : > { %s373_s29 = scalar_lea.vmem [#allocation8], %s1391_s23 }
  0x3c   : > { %1198 = dma.done.wait (%p1310_p8), %s370_s28, 256  }
  0x3d   : > { %1200 = vsyncadd (%p1310_p8), %s370_s28, 4294967040  ;;  %v1411_v0 = vld [vmem:[%s343_s10] sm:$0xff]  ;;  %v1413_v1 = vld [vmem:[%s353_s11] sm:$0xff]  ;;  %s383_s24 = scalar_lea.vmem [#allocation10], %s1391_s23  ;;  %vm447_vm0 = vcmask 1043456   ;;  %vm531_vm1 = vcmask 1040384  }
  0x3e   : > { %v439_v2 = vsub.f32 %v1413_v1, %v1411_v0  ;;  %v1417_v3 = vld [vmem:[%s363_s12] sm:$0xff]  ;;  %v1421_v7 = vld [vmem:[%s373_s29] sm:$0xff]  ;;  %vm534_vm2 = vcmask 1041408   ;;  %vm537_vm3 = vcmask 1042432   ;;  %s892_s30 = sshll.u32 %s1219_s21, 3  ;;  %s430_s21 = scalar_lea.vmem [#allocation11], %s1391_s23 }
  0x3f   : > { %v463_v5 = vsub.f32 %v1417_v3, %v1411_v0  ;;  %v486_v10 = vsub.f32 %v1421_v7, %v1411_v0  ;;  %v1426_v12 = vld [vmem:[%s383_s24] sm:$0xff]  ;;  %s669_s9 = scalar_lea.hbm %s1493_s5, %s892_s30  ;;  %s671_s13 = sshll.u32 %s430_s21, 4  ;;  %s672_s13 = int_to_ptr.vmem [resolvable:$true] %s671_s13 }
  0x40   : > { %v440_v4 = vmul.f32 %v439_v2, %v439_v2  ;;  %v509_v15 = vsub.f32 %v1426_v12, %v1411_v0  ;;  %s673_s1 = sshll.u32 %s669_s9, 4  ;;  %s656_s25 = scalar_lea.sflag [#allocation4], %s1388_s3  ;;  %s674_s1 = int_to_ptr.hbm [resolvable:$true] %s673_s1 }
  0x41   : > { %v464_v6 = vmul.f32 %v463_v5, %v463_v5  ;;  %v487_v11 = vmul.f32 %v486_v10, %v486_v10  ;;  %s1151_s26 = sshra.s32 %s674_s1, 4  ;;  %s1157_s16 = scalar_lea.hbm %s1493_s5, 16  ;;  %s1152_s26 = int_to_ptr.hbm [resolvable:$true] %s1151_s26 }
  0x42   : > { %442 = vst [vmem:[#allocation1] ss:$2 sm:$0xff] %v440_v4  ;;  %v510_v22 = vmul.f32 %v509_v15, %v509_v15  ;;  %s1153_s27 = scalar_lea.hbm %s1152_s26, 8  ;;  %p1158_p7 = scmp.lt.s32.totalorder %s1152_s26, %s1493_s5 }
  0x43   : > { %p1154_p4 = scmp.ne.s32.totalorder %s1152_s26, %s1153_s27  ;;  %p1159_p8 = scmp.lt.s32.totalorder %s1157_s16, %s1153_s27 }
  0x45   : > { %p1155_p5 = pnand %p1154_p4, %p1314_p9  ;;  %p1160_p10 = por %p1159_p8, %p1158_p7 }
  0x47   : > { %p1156_p6 = pneg %p1155_p5 }
  0x49   : > { %v443_v8 = vld.sshfl [vmem:[#allocation1] sm:$0xff pattern:$0x75316420]  ;;  %v444_v9 = vld.sshfl [vmem:[#allocation1 + $0x8] sm:$0xff pattern:$0x75316420]  ;;  %p1161_p13 = pnand %p1160_p10, %p1156_p6 }
  0x4a   : > { %466 = vst [vmem:[#allocation1] ss:$2 sm:$0xff] %v464_v6  ;;  %v448_v18 = vsel %vm447_vm0, %v443_v8, 0.0  ;;  %v455_v19 = vsel %vm447_vm0, %v444_v9, 0.0 }
  0x4b   : > { %v449_v23 = vrot.slane %v448_v18, 4  ;;  %v456_v24 = vrot.slane %v455_v19, 4 }
  0x4d   : > { %v450_v31 = vadd.f32 %v449_v23, %v448_v18  ;;  %v457_v32 = vadd.f32 %v456_v24, %v455_v19 }
  0x4f   : > { %v451_v39 = vrot.slane %v450_v31, 2  ;;  %v458_v40 = vrot.slane %v457_v32, 2 }
  0x51   : > { %v467_v13 = vld.sshfl [vmem:[#allocation1] sm:$0xff pattern:$0x75316420]  ;;  %v468_v14 = vld.sshfl [vmem:[#allocation1 + $0x8] sm:$0xff pattern:$0x75316420]  ;;  %v452_v51 = vadd.f32 %v451_v39, %v450_v31  ;;  %v459_v52 = vadd.f32 %v458_v40, %v457_v32 }
  0x52   : > { %v471_v16 = vsel %vm447_vm0, %v467_v13, 0.0  ;;  %v478_v17 = vsel %vm447_vm0, %v468_v14, 0.0  ;;  %489 = vst [vmem:[#allocation1] ss:$2 sm:$0xff] %v487_v11 }
  0x53   : > { %v472_v20 = vrot.slane %v471_v16, 4  ;;  %v479_v21 = vrot.slane %v478_v17, 4  ;;  %v453_v61 = vrot.slane %v452_v51, 1  ;;  %v460_v62 = vrot.slane %v459_v52, 1 }
  0x55   : > { %v473_v25 = vadd.f32 %v472_v20, %v471_v16  ;;  %v480_v26 = vadd.f32 %v479_v21, %v478_v17  ;;  %v454_v11 = vadd.f32 %v453_v61, %v452_v51  ;;  %v461_v13 = vadd.f32 %v460_v62, %v459_v52 }
  0x57   : > { %v474_v35 = vrot.slane %v473_v25, 2  ;;  %v481_v36 = vrot.slane %v480_v26, 2 }
  0x59   : > { %v490_v27 = vld.sshfl [vmem:[#allocation1] sm:$0xff pattern:$0x75316420]  ;;  %v491_v28 = vld.sshfl [vmem:[#allocation1 + $0x8] sm:$0xff pattern:$0x75316420]  ;;  %v475_v43 = vadd.f32 %v474_v35, %v473_v25  ;;  %v482_v44 = vadd.f32 %v481_v36, %v480_v26 }
  0x5a   : > { %v494_v29 = vsel %vm447_vm0, %v490_v27, 0.0  ;;  %v501_v30 = vsel %vm447_vm0, %v491_v28, 0.0  ;;  %512 = vst [vmem:[#allocation1] ss:$2 sm:$0xff] %v510_v22 }
  0x5b   : > { %v495_v33 = vrot.slane %v494_v29, 4  ;;  %v502_v34 = vrot.slane %v501_v30, 4  ;;  %v476_v55 = vrot.slane %v475_v43, 1  ;;  %v483_v56 = vrot.slane %v482_v44, 1 }
  0x5d   : > { %v496_v37 = vadd.f32 %v495_v33, %v494_v29  ;;  %v503_v38 = vadd.f32 %v502_v34, %v501_v30  ;;  %v477_v4 = vadd.f32 %v476_v55, %v475_v43  ;;  %v484_v5 = vadd.f32 %v483_v56, %v482_v44 }
  0x5f   : > { %v497_v41 = vrot.slane %v496_v37, 2  ;;  %v504_v42 = vrot.slane %v503_v38, 2  ;;  %v532_v16 = vsel %vm531_vm1, %v454_v11, %v477_v4  ;;  %v533_v17 = vsel %vm531_vm1, %v461_v13, %v484_v5 }
  0x61   : > { %v513_v45 = vld.sshfl [vmem:[#allocation1] sm:$0xff pattern:$0x75316420]  ;;  %v514_v46 = vld.sshfl [vmem:[#allocation1 + $0x8] sm:$0xff pattern:$0x75316420]  ;;  %v498_v47 = vadd.f32 %v497_v41, %v496_v37  ;;  %v505_v48 = vadd.f32 %v504_v42, %v503_v38 }
  0x62   : > { %v517_v49 = vsel %vm447_vm0, %v513_v45, 0.0  ;;  %v524_v50 = vsel %vm447_vm0, %v514_v46, 0.0 }
  0x63   : > { %v518_v53 = vrot.slane %v517_v49, 4  ;;  %v525_v54 = vrot.slane %v524_v50, 4  ;;  %v499_v59 = vrot.slane %v498_v47, 1  ;;  %v506_v60 = vrot.slane %v505_v48, 1 }
  0x65   : > { %v519_v57 = vadd.f32 %v518_v53, %v517_v49  ;;  %v526_v58 = vadd.f32 %v525_v54, %v524_v50  ;;  %v500_v9 = vadd.f32 %v499_v59, %v498_v47  ;;  %v507_v10 = vadd.f32 %v506_v60, %v505_v48 }
  0x67   : > { %v520_v63 = vrot.slane %v519_v57, 2  ;;  %v527_v2 = vrot.slane %v526_v58, 2  ;;  %v535_v20 = vsel %vm534_vm2, %v532_v16, %v500_v9  ;;  %v536_v21 = vsel %vm534_vm2, %v533_v17, %v507_v10 }
  0x69   : > { %v521_v6 = vadd.f32 %v520_v63, %v519_v57  ;;  %v528_v8 = vadd.f32 %v527_v2, %v526_v58 }
  0x6b   : > { %v522_v14 = vrot.slane %v521_v6, 1  ;;  %v529_v15 = vrot.slane %v528_v8, 1 }
  0x6d   : > { %v523_v18 = vadd.f32 %v522_v14, %v521_v6  ;;  %v530_v19 = vadd.f32 %v529_v15, %v528_v8 }
  0x6f   : > { %v538_v22 = vsel %vm537_vm3, %v535_v20, %v523_v18  ;;  %v539_v23 = vsel %vm537_vm3, %v536_v21, %v530_v19 }
  0x70   : > { %975 = vrsqrt.f32 %v538_v22  ;;  %vm547_vm4 = vcmp.eq.f32.partialorder %v538_v22, inf  ;;  %v550_v37 = vand.u32 2147483648, %v538_v22  ;;  %vm549_vm5 = vcmp.eq.f32.partialorder %v538_v22, 0.0 }
  0x71   : > { %977 = vrsqrt.f32 %v539_v23  ;;  %vm559_vm6 = vcmp.eq.f32.partialorder %v539_v23, inf  ;;  %v562_v40 = vand.u32 2147483648, %v539_v23  ;;  %vm561_vm7 = vcmp.eq.f32.partialorder %v539_v23, 0.0 }
  0x76   : > { %v976_v24 = vpop.eup %975 }
  0x77   : > { %v978_v25 = vpop.eup %977  ;;  %v541_v26 = vmul.f32 %v976_v24, %v538_v22 }
  0x78   : > { %v553_v27 = vmul.f32 %v978_v25, %v539_v23 }
  0x79   : > { %v542_v28 = vmul.f32 %v976_v24, %v541_v26 }
  0x7a   : > { %v554_v29 = vmul.f32 %v978_v25, %v553_v27 }
  0x7b   : > { %v543_v30 = vmul.f32 0.5, %v542_v28 }
  0x7c   : > { %v555_v31 = vmul.f32 0.5, %v554_v29 }
  0x7d   : > { %v544_v32 = vsub.f32 1.5, %v543_v30 }
  0x7e   : > { %v556_v33 = vsub.f32 1.5, %v555_v31 }
  0x7f   : > { %v545_v34 = vmul.f32 %v976_v24, %v544_v32 }
  0x80   : > { %v557_v35 = vmul.f32 %v978_v25, %v556_v33 }
  0x81   : > { %v546_v36 = vmul.f32 %v545_v34, %v538_v22 }
  0x82   : > { %v558_v38 = vmul.f32 %v557_v35, %v539_v23 }
  0x83   : > { %v548_v39 = vsel %vm547_vm4, %v538_v22, %v546_v36 }
  0x84   : > { %v551_v41 = vsel %vm549_vm5, %v550_v37, %v548_v39  ;;  %v560_v42 = vsel %vm559_vm6, %v539_v23, %v558_v38 }
  0x85   : > { %v563_v43 = vsel %vm561_vm7, %v562_v40, %v560_v42  ;;  %v564_v44 = vmin.f32 %v551_v41, 100.0 }
  0x86   : > { %v565_v45 = vmin.f32 %v563_v43, 100.0 }
  0x87   : > { %v566_v46 = vsub.f32 0.0, %v564_v44 }
  0x88   : > { %v567_v47 = vsub.f32 0.0, %v565_v45 }
  0x89   : > { %v568_v48 = vmul.f32 1.442695, %v566_v46 }
  0x8a   : > { %v570_v49 = vmul.f32 1.442695, %v567_v47 }
  0x8b   : > { %979 = vpow2.f32 %v568_v48 }
  0x8c   : > { %981 = vpow2.f32 %v570_v49 }
  0x91   : > { %v980_v50 = vpop.eup %979 }
  0x92   : > { %v982_v51 = vpop.eup %981  ;;  %v572_v52 = vsel %vm447_vm0, %v980_v50, 0.0 }
  0x93   : > { %v573_v53 = vrot.slane %v572_v52, 4  ;;  %v579_v54 = vsel %vm447_vm0, %v982_v51, 0.0 }
  0x94   : > { %v580_v55 = vrot.slane %v579_v54, 4 }
  0x95   : > { %v574_v56 = vadd.f32 %v573_v53, %v572_v52 }
  0x96   : > { %v581_v57 = vadd.f32 %v580_v55, %v579_v54 }
  0x97   : > { %v575_v58 = vrot.slane %v574_v56, 2 }
  0x98   : > { %v582_v59 = vrot.slane %v581_v57, 2 }
  0x99   : > { %v576_v60 = vadd.f32 %v575_v58, %v574_v56 }
  0x9a   : > { %v583_v61 = vadd.f32 %v582_v59, %v581_v57 }
  0x9b   : > { %v577_v62 = vrot.slane %v576_v60, 1 }
  0x9c   : > { %v584_v63 = vrot.slane %v583_v61, 1 }
  0x9d   : > { %v578_v2 = vadd.f32 %v577_v62, %v576_v60 }
  0x9e   : > { %v585_v4 = vadd.f32 %v584_v63, %v583_v61 }
  0x9f   : > { %v586_v5 = vadd.f32 1e-09, %v578_v2 }
  0xa0   : > { %v587_v6 = vadd.f32 1e-09, %v585_v4 }
  0xa1   : > { %983 = vrcp.f32 %v586_v5  ;;  %v599_v14 = vand.u32 2147483648, %v586_v5  ;;  %v597_v17 = vand.u32 2147483647, %v586_v5  ;;  %vm593_vm10 = vweird.f32 %v586_v5 }
  0xa2   : > { %985 = vrcp.f32 %v587_v6  ;;  %v613_v18 = vand.u32 2147483648, %v587_v6  ;;  %v611_v20 = vand.u32 2147483647, %v587_v6  ;;  %vm607_vm12 = vweird.f32 %v587_v6 }
  0xa3   : > { %v600_v22 = vor.u32 1.1754944e-38, %v599_v14  ;;  %vm598_vm13 = vcmp.eq.f32.partialorder %v597_v17, 8.507059e+37 }
  0xa4   : > { %v614_v25 = vor.u32 1.1754944e-38, %v613_v18  ;;  %vm612_vm15 = vcmp.eq.f32.partialorder %v611_v20, 8.507059e+37 }
  0xa7   : > { %v984_v8 = vpop.eup %983 }
  0xa8   : > { %v986_v9 = vpop.eup %985  ;;  %v589_v10 = vmul.f32 %v984_v8, %v586_v5  ;;  %vm594_vm8 = vweird.f32 %v984_v8 }
  0xa9   : > { %v603_v11 = vmul.f32 %v986_v9, %v587_v6  ;;  %vm608_vm9 = vweird.f32 %v986_v9  ;;  %vm595_vm11 = vmor %vm593_vm10, %vm594_vm8 }
  0xaa   : > { %v590_v13 = vsub.f32 1.0, %v589_v10  ;;  %vm609_vm14 = vmor %vm607_vm12, %vm608_vm9 }
  0xab   : > { %v604_v15 = vsub.f32 1.0, %v603_v11 }
  0xac   : > { %v591_v16 = vmul.f32 %v984_v8, %v590_v13 }
  0xad   : > { %v605_v19 = vmul.f32 %v986_v9, %v604_v15 }
  0xae   : > { %v592_v21 = vadd.f32 %v984_v8, %v591_v16 }
  0xaf   : > { %v606_v23 = vadd.f32 %v986_v9, %v605_v19 }
  0xb0   : > { %v596_v24 = vsel %vm595_vm11, %v984_v8, %v592_v21 }
  0xb1   : > { %v601_v26 = vsel %vm598_vm13, %v600_v22, %v596_v24  ;;  %v610_v27 = vsel %vm609_vm14, %v986_v9, %v606_v23 }
  0xb2   : > { %v615_v28 = vsel %vm612_vm15, %v614_v25, %v610_v27  ;;  %v616_v29 = vmul.f32 %v980_v50, %v601_v26 }
  0xb3   : > { %v617_v30 = vmul.f32 %v982_v51, %v615_v28 }
  0xb4   : > { %v618_v35 = vperm.slane %v616_v29, 0  ;;  %v627_v37 = vperm.slane %v616_v29, 1  ;;  %v636_v42 = vperm.slane %v616_v29, 2  ;;  %v645_v46 = vperm.slane %v616_v29, 3 }
  0xb5   : > { %v619_v31 = vperm.slane %v617_v30, 0  ;;  %v628_v32 = vperm.slane %v617_v30, 1  ;;  %v637_v33 = vperm.slane %v617_v30, 2  ;;  %v646_v34 = vperm.slane %v617_v30, 3 }
  0xb7   : > { %v622_v36 = vrot.slane %v619_v31, 4  ;;  %v631_v38 = vrot.slane %v628_v32, 4  ;;  %v640_v39 = vrot.slane %v637_v33, 4  ;;  %v649_v43 = vrot.slane %v646_v34, 4 }
  0xb9   : > { %v623_v40 = vsel %vm447_vm0, %v618_v35, %v622_v36  ;;  %v632_v41 = vsel %vm447_vm0, %v627_v37, %v631_v38  ;;  %v641_v45 = vsel %vm447_vm0, %v636_v42, %v640_v39  ;;  %v650_v49 = vsel %vm447_vm0, %v645_v46, %v649_v43 }
  0xba   : > { %v625_v44 = vmul.f32 %v623_v40, %v1413_v1  ;;  %v634_v48 = vmul.f32 %v632_v41, %v1417_v3  ;;  %v643_v51 = vmul.f32 %v641_v45, %v1421_v7  ;;  %v652_v52 = vmul.f32 %v650_v49, %v1426_v12 }
  0xbc   : > { %v626_v47 = vadd.f32 %v625_v44, %v1411_v0 }
  0xbe   : > { %v635_v50 = vadd.f32 %v634_v48, %v626_v47 }
  0xc0   : > { %v644_v1 = vadd.f32 %v643_v51, %v635_v50 }
  0xc2   : > { %v653_v0 = vadd.f32 %v652_v52, %v644_v1 }
  0xc4   : > { %654 = vst [vmem:[%s430_s21] sm:$0xff] %v653_v0 }
  0xc5   : > { %1164 = shalt.err (!%p1161_p13)
}
  0xc6   : > { %903 = dma.vmem_to_hbm [thread:$0]  (%p1314_p9), %s672_s13, 128, %s674_s1, %s656_s25  }
  0xc7 PF: > { %s1518_s3 = sld [smem:[#allocation18_spill]]  ;;  %s685_s10 = sand.u32 1, %s1207_s18  }
  0xc8   : > { %p922_p0 = pnand %p859_p12, %p1321_p11  ;;  %s686_s0 = scalar_lea.sflag [#allocation4], %s685_s10 }
  0xca   : > { %p923_p1 = pneg %p922_p0 }
  0xcc   : > { %1202 = dma.done.wait (%p923_p1), %s686_s0, 128  }
  0xcd   : > { %1204 = vsyncadd (%p923_p1), %s686_s0, 4294967168  ;;  %s27_s23 = sadd.s32 1, %s1518_s3   ;;  %s1519_s20 = sld [smem:[#allocation16_spill]] }
  0xce   : > { %p24_p2 = scmp.ge.s32.totalorder %s27_s23, 4   ;;  %s1520_s11 = sld [smem:[#allocation20_spill]] }
  0xcf   : > { %s1521_s21 = sld [smem:[#allocation17_spill]]  ;;  %s1523_s18 = smov %s1211_s19 }
  0xd0   : > { %s1522_s22 = sld [smem:[#allocation19_spill]]  ;;  %26 = sbr.rel (!%p24_p2) target bundleno = 14 (0xe), region = 133 }
  0xd3   : > { %s1524_s19 = smov %s1519_s20 }
  0xd4   : > { %s1525_s20 = smov %s1520_s11 }
  0xd5   :  { %692 = vsyncpa [#allocation3], 1 }
  0xd6   :  { %694 = vsyncpa [#allocation3 + $0x1], 1 }
  0xd7   :  { %695 = vsyncpa [#allocation6], 1 }
  0xd8   :  { %697 = vsyncpa [#allocation6 + $0x1], 1 }
  0xd9   :  { %698 = vsyncpa [#allocation9], 1 }
  0xda   :  { %700 = vsyncpa [#allocation9 + $0x1], 1 }
  0xdb   :  { %701 = vsyncpa [#allocation4], 1 }
  0xdc   :  { %703 = vsyncpa [#allocation4 + $0x1], 1 }

</bundles_post_ra>
